<compile_context>
chip_gen: v7x
topology: tpu7x:2x2x1
jax: 0.10.0
libtpu: 0.0.40
codegen_flags: <defaults>
</compile_context>

<pallas_src>
import math

import jax
import jax.numpy as jnp
from jax.experimental import pallas as pl
from jax.experimental.pallas import tpu as pltpu

D = 128   # GraphConvolution(128, 128) feature size
H = 128   # SemanticAttention hidden size (default 128)


# --------------------------------------- helpers ---------------------------------------
def _round_up(x, m):
    return ((x + m - 1) // m) * m


def _vmem_limit_bytes():
    """~3/4 of physical VMEM, capped at 100 MiB (-> ~48 MiB on 64-MiB v7x, 96 MiB on v5e/v6e)."""
    try:
        cap = pltpu.get_tpu_info().vmem_capacity_bytes
    except Exception:
        cap = 64 * 1024 * 1024
    return int(min(cap * 3 // 4, 100 * 1024 * 1024))


def _pick_row_tile(n_padded, budget_bytes=16 * 1024 * 1024):
    """Largest TM in {512,256,128} dividing n_padded whose double-buffered f32 adj tile fits."""
    for t in (512, 256, 128):
        if n_padded % t == 0 and t * n_padded * 4 * 2 <= budget_bytes:
            return t
    return 128


def _pick_stream_tile(n_padded, cap=1024):
    """Large, lane/sublane-aligned row tile for pure streaming kernels."""
    for t in (1024, 512, 256, 128):
        if t <= cap and n_padded % t == 0:
            return t
    return 128


# ------------------------- Kernel 0: support_m = h @ W_m (bf16) -------------------------
def support_kernel(h_ref, w_ref, sup_ref):
    # h_ref: (TS, D) f32, w_ref: (1, D, D) f32, sup_ref: (1, TS, D) bf16
    h_bf = h_ref[...].astype(jnp.bfloat16)
    w_bf = w_ref[0].astype(jnp.bfloat16)
    sup_ref[0] = jnp.dot(h_bf, w_bf, preferred_element_type=jnp.float32).astype(jnp.bfloat16)


def support_forward(h_pad, gcn_W, vmem_limit):
    n_pad, _ = h_pad.shape
    M = gcn_W.shape[0]
    ts = _pick_stream_tile(n_pad, cap=512)
    return pl.pallas_call(
        support_kernel,
        out_shape=jax.ShapeDtypeStruct((M, n_pad, D), jnp.bfloat16),
        grid=(M, n_pad // ts),
        in_specs=[
            pl.BlockSpec((ts, D), lambda m, s: (s, 0)),       # h row tile
            pl.BlockSpec((1, D, D), lambda m, s: (m, 0, 0)),  # W_m
        ],
        out_specs=pl.BlockSpec((1, ts, D), lambda m, s: (m, s, 0)),
        compiler_params=pltpu.CompilerParams(
            dimension_semantics=("parallel", "parallel"),
            vmem_limit_bytes=vmem_limit,
        ),
    )(h_pad, gcn_W)


# ---------- Kernel 1: tiled GCN (adj @ support) + fused semantic-attention partials ----------
def _make_gcn_score_kernel(tm, n_valid, n_padded):
    apply_mask = (n_valid != n_padded)

    def kernel(adj_ref, sup_ref, b_ref, w1_ref, b1_ref, w2_ref, z_ref, score_ref):
        # adj_ref  : (1, TM, Np) f32  adjacency row tile (cast to bf16 in-register below)
        # sup_ref  : (1, Np, D)  bf16 precomputed h @ W_m (resident per metapath)
        # b_ref    : (1, 1, D)   f32  GCN bias
        # w1_ref   : (D, H) f32, b1_ref/w2_ref: (1, H) f32  attention params
        # z_ref    : (1, TM, D)  bf16 output row tile
        # score_ref: (1, 1, 1, H) f32 per-(m, j) score partial (reduced in wrapper)
        adj_bf = adj_ref[0].astype(jnp.bfloat16)        # in-kernel cast: no wrapper cast pass
        out = jnp.dot(adj_bf, sup_ref[0], preferred_element_type=jnp.float32) + b_ref[0]
        z = jnp.where(out > 0, out, jnp.expm1(out))     # ELU (alpha = 1)
        z_bf = z.astype(jnp.bfloat16)
        z_ref[0] = z_bf                                 # bf16 z: halves the z HBM round-trip

        # Fused score partial while the z tile is still in VMEM (bf16 MXU inputs, f32 acc):
        #   score_m += sum_rows( tanh(z @ W1 + b1) * w2 )   (sum over H and /N in wrapper)
        w1_bf = w1_ref[...].astype(jnp.bfloat16)
        proj = jnp.tanh(jnp.dot(z_bf, w1_bf, preferred_element_type=jnp.float32)
                        + b1_ref[...])                  # (TM, H) f32
        contrib = proj * w2_ref[...]                    # (TM, H)
        if apply_mask:                                  # zero out padded tail rows
            j = pl.program_id(1)
            rows = jax.lax.broadcasted_iota(jnp.int32, (tm, 1), 0) + j * tm
            contrib = contrib * (rows < n_valid).astype(jnp.float32)
        score_ref[0, 0] = jnp.sum(contrib, axis=0, keepdims=True)   # (1, H)

    return kernel


def gcn_score_forward(adj_pad, support, gcn_b, att_W1, att_b1, att_w2,
                      tm, n_valid, vmem_limit):
    M, n_pad, _ = adj_pad.shape
    T = n_pad // tm

    cost = pl.CostEstimate(
        flops=2 * M * n_pad * n_pad * D + 2 * M * n_pad * D * H,
        transcendentals=M * n_pad * (D + H),
        bytes_accessed=(M * n_pad * n_pad * 4           # adj f32 streamed
                        + T * M * n_pad * D * 2         # support re-read per row tile
                        + M * n_pad * D * 2             # z bf16 write
                        + M * (D + 2) * H * 4),
    )

    kernel = _make_gcn_score_kernel(tm, n_valid, n_pad)
    z, score_parts = pl.pallas_call(
        kernel,
        out_shape=(
            jax.ShapeDtypeStruct((M, n_pad, D), jnp.bfloat16),
            jax.ShapeDtypeStruct((M, T, 1, H), jnp.float32),
        ),
        grid=(M, T),
        in_specs=[
            pl.BlockSpec((1, tm, n_pad), lambda m, j: (m, j, 0)),    # adj row tile (f32 stream)
            pl.BlockSpec((1, n_pad, D), lambda m, j: (m, 0, 0)),     # support_m (resident per m)
            pl.BlockSpec((1, 1, D), lambda m, j: (m, 0, 0)),         # b_m
            pl.BlockSpec((D, H), lambda m, j: (0, 0)),               # W1
            pl.BlockSpec((1, H), lambda m, j: (0, 0)),               # b1
            pl.BlockSpec((1, H), lambda m, j: (0, 0)),               # w2
        ],
        out_specs=(
            pl.BlockSpec((1, tm, D), lambda m, j: (m, j, 0)),        # z row tile (bf16)
            pl.BlockSpec((1, 1, 1, H), lambda m, j: (m, j, 0, 0)),   # score partial per (m, j)
        ),
        compiler_params=pltpu.CompilerParams(
            dimension_semantics=("parallel", "parallel"),            # both axes TC-shardable (v7x)
            vmem_limit_bytes=vmem_limit,
        ),
        cost_estimate=cost,
    )(adj_pad, support, gcn_b.reshape(M, 1, D), att_W1,
      att_b1.reshape(1, H), att_w2.reshape(1, H))
    return z, score_parts


# -------------------- Kernel 2: beta-weighted sum over metapaths (streamed) --------------------
def weighted_sum_kernel(beta_ref, z_ref, out_ref):
    # beta_ref: (M, 1, D) f32; z_ref: (M, TM2, D) bf16; out_ref: (TM2, D) f32
    num_paths = z_ref.shape[0]
    acc = z_ref[0].astype(jnp.float32) * beta_ref[0]
    for m in range(1, num_paths):
        acc = acc + z_ref[m].astype(jnp.float32) * beta_ref[m]
    out_ref[...] = acc


def weighted_sum_forward(z, beta, vmem_limit):
    M, n_pad, _ = z.shape
    tm2 = _pick_stream_tile(n_pad, cap=1024)   # large streaming tile, decoupled from kernel-1 TM
    beta_b = jnp.broadcast_to(beta.reshape(M, 1, 1).astype(jnp.float32), (M, 1, D))

    cost = pl.CostEstimate(
        flops=2 * M * n_pad * D,
        transcendentals=0,
        bytes_accessed=M * n_pad * D * 2 + n_pad * D * 4 + M * D * 4,
    )

    return pl.pallas_call(
        weighted_sum_kernel,
        out_shape=jax.ShapeDtypeStruct((n_pad, D), jnp.float32),
        grid=(n_pad // tm2,),
        in_specs=[
            pl.BlockSpec((M, 1, D), lambda j: (0, 0, 0)),       # beta (resident, tiny)
            pl.BlockSpec((M, tm2, D), lambda j: (0, j, 0)),     # z row tiles (all metapaths)
        ],
        out_specs=pl.BlockSpec((tm2, D), lambda j: (j, 0)),
        compiler_params=pltpu.CompilerParams(
            dimension_semantics=("parallel",),
            vmem_limit_bytes=vmem_limit,
        ),
        cost_estimate=cost,
    )(beta_b, z)


# --------------------------------------- HANLayer wrapper ---------------------------------------
def han_layer_forward(adj, h, gcn_W, gcn_b, att_W1, att_b1, att_w2):
    """adj: (M, N, N) f32, h: (N, D) f32 -> (N, D) f32. Dense-adjacency HANLayer.forward."""
    M, N, _ = adj.shape
    n_pad = _round_up(N, 128)
    if n_pad != N:                               # pad to (8,128)-aligned tiles; tail masked in-kernel
        adj = jnp.pad(adj, ((0, 0), (0, n_pad - N), (0, n_pad - N)))
        h = jnp.pad(h, ((0, n_pad - N), (0, 0)))
    tm = _pick_row_tile(n_pad)
    vmem_limit = _vmem_limit_bytes()

    support = support_forward(h, gcn_W, vmem_limit)                           # (M, Np, D) bf16
    z, score_parts = gcn_score_forward(adj, support, gcn_b, att_W1, att_b1,
                                       att_w2, tm, N, vmem_limit)
    score = jnp.sum(score_parts, axis=(1, 2, 3)) / N                          # (M,) mean over nodes
    beta = jax.nn.softmax(score)                                              # (M,) softmax over metapaths
    out = weighted_sum_forward(z, beta, vmem_limit)                           # (Np, D) f32
    return out[:N]


# ------------------------------------------ reference -------------------------------------------
def reference(adj, h, gcn_W, gcn_b, att_W1, att_b1, att_w2):
    """Pure-JAX reference mirroring the kernel's numerics (bf16 MXU inputs, f32 accumulation)."""
    M = adj.shape[0]
    h_bf = h.astype(jnp.bfloat16)
    embs = []
    for i in range(M):
        support = jnp.dot(h_bf, gcn_W[i].astype(jnp.bfloat16),
                          preferred_element_type=jnp.float32).astype(jnp.bfloat16)
        out = jnp.dot(adj[i].astype(jnp.bfloat16), support,
                      preferred_element_type=jnp.float32) + gcn_b[i]
        z = jnp.where(out > 0, out, jnp.expm1(out))
        embs.append(z.astype(jnp.bfloat16))
    z = jnp.stack(embs, axis=1)                                       # (N, M, D) torch layout
    proj = jnp.tanh(
        jnp.einsum("nmd,dh->nmh", z, att_W1.astype(jnp.bfloat16),
                   preferred_element_type=jnp.float32) + att_b1)
    w = jnp.einsum("nmh,h->nm", proj, att_w2)                         # (N, M)
    w = w.mean(0)                                                     # (M,)
    beta = jax.nn.softmax(w, axis=0)                                  # (M,)
    return jnp.einsum("m,nmd->nd", beta, z.astype(jnp.float32))       # (N, D)


if __name__ == "__main__":
    M = 3     # num_meta_paths
    key = jax.random.PRNGKey(0)
    k_adj, k_h, k_w, k_b, k_w1, k_b1, k_w2 = jax.random.split(key, 7)

    stdv = 1.0 / math.sqrt(D)
    gcn_W = jax.random.uniform(k_w, (M, D, D), minval=-stdv, maxval=stdv, dtype=jnp.float32)
    gcn_b = jax.random.uniform(k_b, (M, D), minval=-stdv, maxval=stdv, dtype=jnp.float32)
    att_W1 = jax.random.uniform(k_w1, (D, H), minval=-stdv, maxval=stdv, dtype=jnp.float32)
    att_b1 = jax.random.uniform(k_b1, (H,), minval=-stdv, maxval=stdv, dtype=jnp.float32)
    att_w2 = jax.random.uniform(k_w2, (H,), minval=-stdv, maxval=stdv, dtype=jnp.float32)

    # N=256: aligned fast path (no padding). N=200: padded + masked-tail path.
    for n_nodes in (256, 200):
        ka, kh = jax.random.split(jax.random.fold_in(k_adj, n_nodes))
        adj = jax.random.uniform(ka, (M, n_nodes, n_nodes), dtype=jnp.float32)
        adj = adj / jnp.sum(adj, axis=-1, keepdims=True)      # row-normalized dense "graphs"
        h = jax.random.normal(kh, (n_nodes, D), dtype=jnp.float32)

        out = jax.block_until_ready(
            han_layer_forward(adj, h, gcn_W, gcn_b, att_W1, att_b1, att_w2))
        ref = reference(adj, h, gcn_W, gcn_b, att_W1, att_b1, att_w2)
        assert out.shape == (n_nodes, D)
        assert jnp.allclose(out, ref, atol=2e-3, rtol=2e-3), f"mismatch vs reference (N={n_nodes})"

    print("KERNEL_OK")
</pallas_src>

<mosaic_0001>
module attributes {stable_mosaic.version = 11 : i64} {
  func.func @support_kernel(%arg0: i32, %arg1: i32, %arg2: memref<256x128xf32, #tpu.memory_space<vmem>>, %arg3: memref<1x128x128xf32, #tpu.memory_space<vmem>>, %arg4: memref<1x256x128xbf16, #tpu.memory_space<vmem>>) attributes {dimension_semantics = [#tpu.dimension_semantics<parallel>, #tpu.dimension_semantics<parallel>], iteration_bounds = array<i64: 3, 1>, scalar_prefetch = 0 : i64, scratch_operands = 0 : i64, tpu.core_type = #tpu.core_type<tc>, window_params = [{transform_indices = @transform_0, window_bounds = array<i64: 256, 128>}, {transform_indices = @transform_1, window_bounds = array<i64: 1, 128, 128>}, {transform_indices = @transform_2, window_bounds = array<i64: 1, 256, 128>}]} {
    %c0 = arith.constant 0 : index
    %c0_0 = arith.constant 0 : index
    %0 = vector.load %arg2[%c0, %c0_0] : memref<256x128xf32, #tpu.memory_space<vmem>>, vector<256x128xf32>
    %1 = arith.truncf %0 : vector<256x128xf32> to vector<256x128xbf16>
    %c0_1 = arith.constant 0 : index
    %c0_2 = arith.constant 0 : index
    %c0_3 = arith.constant 0 : index
    %2 = vector.load %arg3[%c0_1, %c0_2, %c0_3] : memref<1x128x128xf32, #tpu.memory_space<vmem>>, vector<1x128x128xf32>
    %3 = vector.shape_cast %2 : vector<1x128x128xf32> to vector<128x128xf32>
    %4 = arith.truncf %3 : vector<128x128xf32> to vector<128x128xbf16>
    %cst = arith.constant dense<0.000000e+00> : vector<256x128xf32>
    %5 = tpu.matmul %1, %4, %cst {dimension_numbers = #tpu.dot_dimension_numbers<[1], [0], [0], [1], [0, 0, 1, 1], [], []>} : vector<256x128xbf16>, vector<128x128xbf16>, vector<256x128xf32> -> vector<256x128xf32>
    %6 = arith.truncf %5 : vector<256x128xf32> to vector<256x128xbf16>
    %c0_4 = arith.constant 0 : index
    %c0_5 = arith.constant 0 : index
    %c0_6 = arith.constant 0 : index
    %7 = vector.load %arg4[%c0_4, %c0_5, %c0_6] : memref<1x256x128xbf16, #tpu.memory_space<vmem>>, vector<1x256x128xbf16>
    %8 = vector.shape_cast %7 : vector<1x256x128xbf16> to vector<256x128xbf16>
    %9 = vector.shape_cast %6 : vector<256x128xbf16> to vector<1x256x128xbf16>
    tpu.vector_store %arg4[%c0_4, %c0_5, %c0_6], %9 {strides = array<i32>} : memref<1x256x128xbf16, #tpu.memory_space<vmem>>, vector<1x256x128xbf16>,
    return
  }
  func.func @transform_0(%arg0: i32, %arg1: i32) -> (i32, i32) {
    %c0_i32 = arith.constant 0 : i32
    %c0_i32_0 = arith.constant 0 : i32
    return %arg1, %c0_i32 : i32, i32
  }
  func.func @transform_1(%arg0: i32, %arg1: i32) -> (i32, i32, i32) {
    %c0_i32 = arith.constant 0 : i32
    %c0_i32_0 = arith.constant 0 : i32
    %c0_i32_1 = arith.constant 0 : i32
    return %arg0, %c0_i32, %c0_i32_0 : i32, i32, i32
  }
  func.func @transform_2(%arg0: i32, %arg1: i32) -> (i32, i32, i32) {
    %c0_i32 = arith.constant 0 : i32
    %c0_i32_0 = arith.constant 0 : i32
    return %arg0, %arg1, %c0_i32 : i32, i32, i32
  }
}

</mosaic_0001>

<bundles_post_ra>
// kernel: tpu_custom_call.1
= control target key start
LH: loop header
LB: loop body
LE: loop exit
PB: predicated region body
PF: predicated region fallthrough
CT: control target
= control target key end

     0   :  { %7 = vsyncpa [#allocation3], 0  ;;  %s1484_s0 = inlined_call_operand.hbm [shape: f32[256,128], index: 0, kind: input, shape index: {}]   ;;  %s1485_s1 = inlined_call_operand.hbm [shape: f32[3,128,128], index: 1, kind: input, shape index: {}]   ;;  %s1486_s2 = inlined_call_operand.hbm [shape: bf16[3,256,128], index: 2, kind: output, shape index: {}]  }
   0x1   :  { %8 = vsyncpa [#allocation6], 0 }
   0x2   :  { %10 = vsyncpa [#allocation6 + $0x1], 0 }
   0x3   :  { %11 = vsyncpa [#allocation4], 0 }
   0x4   :  { %13 = vsyncpa [#allocation4 + $0x1], 0  ;;  %s1220_s9 = smov 0   ;;  %s1222_s10 = smov 0  }
   0x5   :  { %s1224_s11 = smov 0   ;;  %s1226_s12 = smov 0  }
   0x6   :  { %s1228_s13 = smov 0   ;;  %s1230_s14 = smov 0  }
   0x7 LB: > { %s709_s15 = sadd.s32 4294967295, %s1196_s14   ;;  %s710_s16 = sadd.s32 4294967294, %s1196_s14   ;;  %s1196_s14 = sphi %s1230_s14, %s19_s14   ;;  %s1192_s13 = sphi %s1228_s13, %s1509_s13   ;;  %s1188_s12 = sphi %s1226_s12, %s1508_s12   ;;  %s1184_s11 = sphi %s1224_s11, %s1507_s11   ;;  %s1180_s10 = sphi %s1222_s10, %s1506_s10   ;;  %s1176_s9 = sphi %s1220_s9, %s1505_s9  }
   0x8   : > { %p77_p0 = scmp.ne.s32.totalorder %s1180_s10, %s1176_s9  ;;  %p1254_p1 = scmp.eq.s32.totalorder %s709_s15, 0 }
   0x9   : > { %p1258_p2 = scmp.eq.s32.totalorder %s709_s15, 2  ;;  %p109_p3 = scmp.eq.s32.totalorder %s710_s16, 2 }
   0xa   : > { %s1491_s17 = scalar_select %p1254_p1, 1, 0 }
   0xb   : > { %s1492_s18 = scalar_select %p1258_p2, 1, 0 }
   0xc   : > { %p1264_p4 = por %p1254_p1, %p77_p0  ;;  %p711_p5 = scmp.ge.s32.totalorder %s1196_s14, 1 }
   0xd   : > { %p1269_p6 = por %p109_p3, %p77_p0  ;;  %p116_p7 = scmp.lt.s32.totalorder %s1196_s14, 4 }
   0xe   : > { %s1493_s19 = scalar_select %p1264_p4, 1, 0 }
   0xf   : > { %s1494_s20 = scalar_select %p1269_p6, 1, 0 }
  0x10   : > { %p1274_p8 = pnand %p711_p5, %p116_p7  ;;  %s1198_s22 = smov [#allocation2]  }
  0x11   : > { %s131_s23 = sshll.u32 %s1198_s22, 4  ;;  %s31_s25 = sadd.s32 1, %s1192_s13  ;;  %s132_s23 = int_to_ptr.vmem [resolvable:$true] %s131_s23 }
  0x12   : > { %s1495_s21 = scalar_select %p1274_p8, 1, 0 }
  0x13   : > { %p983_p9 = pneg %p1274_p8  ;;  %s1052_s28 = scalar_lea.hbm %s1484_s0, 4096 }
  0x14   : > { %p1053_p11 = scmp.ne.s32.totalorder %s1484_s0, %s1052_s28  ;;  %p1059_p3 = scmp.lt.u32.totalorder %s1052_s28, %s1484_s0 }
  0x15   : > { %p1282_p10 = pnand %p983_p9, %p1254_p1 }
  0x17   : > { %p1054_p12 = pneg %p1282_p10 }
  0x19   : > { %p1055_p13 = pnand %p1054_p12, %p1053_p11 }
  0x1b   : > { %p1056_p0 = pneg %p1055_p13 }
  0x1d   : > { %p1061_p5 = pnand %p1059_p3, %p1056_p0 }
  0x1f   : > { %1064 = shalt.err (!%p1061_p5)
}
  0x20   : > { %s1065_s5 = scalar_lea.vmem %s132_s23, 4096  ;;  %p1073_p4 = scmp.lt.s32.totalorder %s132_s23, %s132_s23 }
  0x21   : > { %p1066_p7 = scmp.ne.s32.totalorder %s132_s23, %s1065_s5  ;;  %p1074_p1 = scmp.lt.s32.totalorder %s1065_s5, %s1065_s5 }
  0x23   : > { %p1068_p9 = pnand %p1066_p7, %p1054_p12  ;;  %p1075_p8 = por %p1074_p1, %p1073_p4 }
  0x25   : > { %p1069_p6 = pneg %p1068_p9 }
  0x27   : > { %p1076_p2 = pnand %p1075_p8, %p1069_p6 }
  0x29   : > { %1079 = shalt.err (!%p1076_p2)
}
  0x2a   : > { %s1199_s6 = smov 128   ;;  %s1200_s7 = smov 8  }
  0x2b   : > { %986 = dma.hbm_to_vmem [thread:$0]  (!%p1282_p10), %s1484_s0, 4096, %s132_s23, [#allocation3], %s1199_s6, %s1199_s6, %s1200_s7  }
  0x2c   : > { %p33_p1 = scmp.ge.s32.totalorder %s31_s25, 3  ;;  %s64_s16 = sadd.s32 1, %s1184_s11 }
  0x2d   : > { %p71_p2 = scmp.ne.s32.totalorder %s1184_s11, %s1180_s10  ;;  %p72_p4 = scmp.eq.s32.totalorder %s1196_s14, 0 }
  0x2e   : > { %s1511_s25 = smov (%p33_p1, %s31_s25), 0  ;;  %p1498_p8 = scmp.ne.s32.totalorder %s1492_s18, 0 }
  0x2f   : > { %p1312_p6 = por %p72_p4, %p71_p2  ;;  %s61_s26 = ssub.s32 %s1192_s13, %s1511_s25 }
  0x30   : > { %p1318_p11 = por %p1498_p8, %p71_p2  ;;  %p996_p12 = scmp.lt.s32.totalorder %s1196_s14, 3 }
  0x31   : > { %p62_p10 = scmp.eq.s32.totalorder %s61_s26, 0  ;;  %s145_s23 = sand.u32 1, %s1184_s11  }
  0x32   : > { %s714_s27 = sshll.u32 %s145_s23, 7  ;;  %s758_s29 = sshll.u32 %s1192_s13, 11 }
  0x33   : > { %s1327_s28 = scalar_select %p62_p10, %s1184_s11, %s64_s16  }
  0x34   : > { %s1333_s4 = scalar_lea.hbm %s1485_s1, %s758_s29  ;;  %s149_s18 = scalar_lea.vmem [#allocation5], %s714_s27 }
  0x35   : > { %s156_s5 = sshll.u32 %s149_s18, 4  ;;  %p1339_p13 = pnand %p996_p12, %p1312_p6  ;;  %s1335_s5 = int_to_ptr.vmem [resolvable:$true] %s156_s5 }
  0x36   : > { %s1343_s15 = scalar_lea.sflag [#allocation6], %s145_s23  ;;  %s1080_s16 = scalar_lea.hbm %s1333_s4, 2048 }
  0x37   : > { %p1081_p0 = scmp.ne.s32.totalorder %s1333_s4, %s1080_s16  ;;  %p1082_p3 = pneg %p1339_p13 }
  0x38   : > { %s1085_s22 = scalar_lea.hbm %s1485_s1, 6144  ;;  %p1086_p9 = scmp.lt.u32.totalorder %s1333_s4, %s1485_s1 }
  0x39   : > { %p1083_p5 = pnand %p1082_p3, %p1081_p0  ;;  %p1087_p1 = scmp.lt.u32.totalorder %s1085_s22, %s1080_s16 }
  0x3a   : > { %p1089_p4 = scmp.lt.u32.totalorder %s1080_s16, %s1333_s4 }
  0x3b   : > { %p1084_p7 = pneg %p1083_p5  ;;  %p1088_p2 = por %p1087_p1, %p1086_p9 }
  0x3d   : > { %p1090_p6 = por %p1089_p4, %p1088_p2 }
  0x3f   : > { %p1091_p8 = pnand %p1090_p6, %p1084_p7 }
  0x41   : > { %1094 = shalt.err (!%p1091_p8)
}
  0x42   : > { %s1095_s23 = scalar_lea.vmem %s1335_s5, 2048  ;;  %s1201_s3 = smov [#allocation5]  }
  0x43   : > { %p1096_p12 = scmp.ne.s32.totalorder %s1335_s5, %s1095_s23  ;;  %s1100_s18 = sshll.u32 %s1201_s3, 4  ;;  %s1101_s18 = int_to_ptr.vmem [resolvable:$false] %s1100_s18 }
  0x44   : > { %s1102_s26 = scalar_lea.vmem %s1101_s18, 4096  ;;  %p1103_p5 = scmp.lt.s32.totalorder %s1335_s5, %s1101_s18 }
  0x45   : > { %p1098_p10 = pnand %p1096_p12, %p1082_p3  ;;  %p1104_p9 = scmp.lt.s32.totalorder %s1102_s26, %s1095_s23 }
  0x47   : > { %p1099_p0 = pneg %p1098_p10  ;;  %p1105_p1 = por %p1104_p9, %p1103_p5 }
  0x49   : > { %p1106_p2 = pnand %p1105_p1, %p1099_p0 }
  0x4b   : > { %1109 = shalt.err (!%p1106_p2)
}
  0x4c   : > { %990 = dma.hbm_to_vmem [thread:$0]  (!%p1339_p13), %s1333_s4, 2048, %s1335_s5, %s1343_s15, %s1199_s6, %s1199_s6, %s1200_s7  }
  0x4d   : > { %p1501_p3 = scmp.ne.s32.totalorder %s1495_s21, 0 }
  0x4e   : > { %p1502_p7 = scmp.ne.s32.totalorder (!%p1501_p3), %s1491_s17, 0 }
  0x4f   : > { %168 = sbr.rel (%p1501_p3) target bundleno = 382 (0x17e), region = 28 }
  0x56   : > { %1163 = dma.done.wait (%p1502_p7), [#allocation3], 4096  }
  0x57   : > { %1165 = vsyncadd (%p1502_p7), [#allocation3], 4294963200  ;;  %s1381_s16 = sand.u32 1, %s1180_s10   ;;  %p1503_p13 = scmp.ne.s32.totalorder %s1493_s19, 0 }
  0x58   : > { %s719_s8 = sshll.u32 %s1381_s16, 7  ;;  %s175_s27 = scalar_lea.sflag [#allocation6], %s1381_s16 }
  0x59   : > { %s1387_s6 = scalar_lea.vmem [#allocation5], %s719_s8 }
  0x5a   : > { %1167 = dma.done.wait (%p1503_p13), %s175_s27, 2048  }
  0x5b   : > { %1169 = vsyncadd (%p1503_p13), %s175_s27, 4294965248  ;;  %v250_v0 = vld [vmem:[%s1387_s6] sm:$0xff]  ;;  %v251_v1 = vld [vmem:[%s1387_s6 + $0x8] sm:$0xff]  ;;  %s1411_s17 = scalar_lea.vmem [#allocation7], %s719_s8  ;;  %s791_s19 = sshll.u32 %s1188_s12, 11 }
  0x5c   : > { %v252_v2 = vld [vmem:[%s1387_s6 + $0x10] sm:$0xff]  ;;  %v266_v3 = vpack.c.bf16 %v251_v1, %v250_v0  ;;  %v253_v4 = vld [vmem:[%s1387_s6 + $0x18] sm:$0xff]  ;;  %v254_v6 = vld [vmem:[%s1387_s6 + $0x20] sm:$0xff]  ;;  %s611_s21 = sshll.u32 %s1411_s17, 4  ;;  %s1430_s5 = scalar_lea.hbm %s1486_s2, %s791_s19  ;;  %s1432_s21 = int_to_ptr.vmem [resolvable:$true] %s611_s21 }
  0x5d   : > { %v267_v5 = vpack.c.bf16 %v253_v4, %v252_v2  ;;  %v255_v7 = vld [vmem:[%s1387_s6 + $0x28] sm:$0xff]  ;;  %v256_v9 = vld [vmem:[%s1387_s6 + $0x30] sm:$0xff]  ;;  %v202_v10 = vld [vmem:[#allocation2] sm:$0xff]  ;;  %s596_s12 = scalar_lea.sflag [#allocation4], %s1381_s16  ;;  %s1110_s15 = scalar_lea.vmem %s1432_s21, 2048 }
  0x5e   : > { %911 = vmatprep.subr.bf16.mxu0 %v266_v3  ;;  %959 = vmatprep.subr.bf16.mxu1 %v266_v3  ;;  %v268_v8 = vpack.c.bf16 %v255_v7, %v254_v6  ;;  %v203_v11 = vld [vmem:[#allocation2 + $0x8] sm:$0xff]  ;;  %v257_v12 = vld [vmem:[%s1387_s6 + $0x38] sm:$0xff]  ;;  %v218_v14 = vld [vmem:[#allocation2 + $0x80] sm:$0xff]  ;;  %p1111_p4 = scmp.ne.s32.totalorder %s1432_s21, %s1110_s15  ;;  %s1202_s22 = smov [#allocation7]  }
  0x5f   : > { %912 = vmatpush3.bf16.msra.mxu0 %v266_v3  ;;  %967 = vmatpush3.bf16.msra.mxu1 %v266_v3  ;;  %v234_v13 = vpack.c.bf16 %v203_v11, %v202_v10  ;;  %v219_v15 = vld [vmem:[#allocation2 + $0x88] sm:$0xff]  ;;  %v269_v17 = vpack.c.bf16 %v257_v12, %v256_v9  ;;  %v258_v18 = vld [vmem:[%s1387_s6 + $0x40] sm:$0xff]  ;;  %v260_v21 = vld [vmem:[%s1387_s6 + $0x50] sm:$0xff]  ;;  %s1114_s29 = sshll.u32 %s1202_s22, 4  ;;  %s1115_s29 = int_to_ptr.vmem [resolvable:$false] %s1114_s29 }
  0x60   : > { %913 = vmatprep.subr.bf16.mxu0 %v267_v5  ;;  %960 = vmatprep.subr.bf16.mxu1 %v267_v5  ;;  %v242_v16 = vpack.c.bf16 %v219_v15, %v218_v14  ;;  %v259_v19 = vld [vmem:[%s1387_s6 + $0x48] sm:$0xff]  ;;  %v261_v22 = vld [vmem:[%s1387_s6 + $0x58] sm:$0xff]  ;;  %v262_v24 = vld [vmem:[%s1387_s6 + $0x60] sm:$0xff]  ;;  %p1112_p6 = pnand %p1111_p4, %p1318_p11  ;;  %s1116_s30 = scalar_lea.vmem %s1115_s29, 4096 }
  0x61   : > { %927 = vmatprep.mubr.bf16.mxu0 %v234_v13  ;;  %v270_v20 = vpack.c.bf16 %v259_v19, %v258_v18  ;;  %v271_v23 = vpack.c.bf16 %v261_v22, %v260_v21  ;;  %v263_v25 = vld [vmem:[%s1387_s6 + $0x68] sm:$0xff]  ;;  %v264_v27 = vld [vmem:[%s1387_s6 + $0x70] sm:$0xff]  ;;  %v265_v28 = vld [vmem:[%s1387_s6 + $0x78] sm:$0xff]  ;;  %p1117_p12 = scmp.lt.s32.totalorder %s1432_s21, %s1115_s29  ;;  %p1118_p10 = scmp.lt.s32.totalorder %s1116_s30, %s1110_s15 }
  0x62   : > { %943 = vmatprep.mubr.bf16.mxu1 %v242_v16  ;;  %v272_v26 = vpack.c.bf16 %v263_v25, %v262_v24  ;;  %v273_v29 = vpack.c.bf16 %v265_v28, %v264_v27  ;;  %v204_v30 = vld [vmem:[#allocation2 + $0x10] sm:$0xff]  ;;  %v205_v31 = vld [vmem:[#allocation2 + $0x18] sm:$0xff]  ;;  %v206_v34 = vld [vmem:[#allocation2 + $0x20] sm:$0xff]  ;;  %p1113_p8 = pneg %p1112_p6 }
  0x63   : > { %914 = vmatpush3.bf16.msra.mxu0 %v267_v5  ;;  %968 = vmatpush3.bf16.msra.mxu1 %v267_v5  ;;  %v220_v32 = vld [vmem:[#allocation2 + $0x90] sm:$0xff]  ;;  %v221_v33 = vld [vmem:[#allocation2 + $0x98] sm:$0xff]  ;;  %v207_v35 = vld [vmem:[#allocation2 + $0x28] sm:$0xff]  ;;  %v235_v38 = vpack.c.bf16 %v205_v31, %v204_v30  ;;  %p1119_p0 = por %p1118_p10, %p1117_p12 }
  0x64   : > { %915 = vmatprep.subr.bf16.mxu0 %v268_v8  ;;  %961 = vmatprep.subr.bf16.mxu1 %v268_v8  ;;  %v222_v36 = vld [vmem:[#allocation2 + $0xa0] sm:$0xff]  ;;  %v223_v37 = vld [vmem:[#allocation2 + $0xa8] sm:$0xff]  ;;  %v243_v39 = vpack.c.bf16 %v221_v33, %v220_v32  ;;  %v236_v40 = vpack.c.bf16 %v207_v35, %v206_v34  ;;  %v208_v42 = vld [vmem:[#allocation2 + $0x30] sm:$0xff] }
  0x65   : > { %v244_v41 = vpack.c.bf16 %v223_v37, %v222_v36  ;;  %v209_v43 = vld [vmem:[#allocation2 + $0x38] sm:$0xff]  ;;  %v224_v44 = vld [vmem:[#allocation2 + $0xb0] sm:$0xff]  ;;  %v210_v46 = vld [vmem:[#allocation2 + $0x40] sm:$0xff]  ;;  %p1120_p5 = pnand %p1119_p0, %p1113_p8 }
  0x66   : > { %v225_v45 = vld [vmem:[#allocation2 + $0xb8] sm:$0xff]  ;;  %v211_v47 = vld [vmem:[#allocation2 + $0x48] sm:$0xff]  ;;  %v226_v48 = vld [vmem:[#allocation2 + $0xc0] sm:$0xff]  ;;  %v237_v50 = vpack.c.bf16 %v209_v43, %v208_v42 }
  0x67   : > { %916 = vmatpush3.bf16.msra.mxu0 %v268_v8  ;;  %969 = vmatpush3.bf16.msra.mxu1 %v268_v8  ;;  %v227_v49 = vld [vmem:[#allocation2 + $0xc8] sm:$0xff]  ;;  %v245_v51 = vpack.c.bf16 %v225_v45, %v224_v44  ;;  %v238_v52 = vpack.c.bf16 %v211_v47, %v210_v46  ;;  %v212_v54 = vld [vmem:[#allocation2 + $0x50] sm:$0xff]  ;;  %v213_v55 = vld [vmem:[#allocation2 + $0x58] sm:$0xff] }
  0x68   : > { %917 = vmatprep.subr.bf16.mxu0 %v269_v17  ;;  %962 = vmatprep.subr.bf16.mxu1 %v269_v17  ;;  %v246_v53 = vpack.c.bf16 %v227_v49, %v226_v48  ;;  %v228_v56 = vld [vmem:[#allocation2 + $0xd0] sm:$0xff]  ;;  %v229_v57 = vld [vmem:[#allocation2 + $0xd8] sm:$0xff]  ;;  %v214_v58 = vld [vmem:[#allocation2 + $0x60] sm:$0xff]  ;;  %v239_v62 = vpack.c.bf16 %v213_v55, %v212_v54 }
  0x69   : > { %v215_v59 = vld [vmem:[#allocation2 + $0x68] sm:$0xff]  ;;  %v230_v60 = vld [vmem:[#allocation2 + $0xe0] sm:$0xff]  ;;  %v247_v63 = vpack.c.bf16 %v229_v57, %v228_v56  ;;  %v216_v2 = vld [vmem:[#allocation2 + $0x70] sm:$0xff] }
  0x6a   : > { %v231_v61 = vld [vmem:[#allocation2 + $0xe8] sm:$0xff]  ;;  %v240_v0 = vpack.c.bf16 %v215_v59, %v214_v58  ;;  %v217_v3 = vld [vmem:[#allocation2 + $0x78] sm:$0xff]  ;;  %v232_v4 = vld [vmem:[#allocation2 + $0xf0] sm:$0xff] }
  0x6b   : > { %918 = vmatpush3.bf16.msra.mxu0 %v269_v17  ;;  %970 = vmatpush3.bf16.msra.mxu1 %v269_v17  ;;  %v248_v1 = vpack.c.bf16 %v231_v61, %v230_v60  ;;  %v233_v5 = vld [vmem:[#allocation2 + $0xf8] sm:$0xff]  ;;  %v241_v6 = vpack.c.bf16 %v217_v3, %v216_v2 }
  0x6c   : > { %919 = vmatprep.subr.bf16.mxu0 %v270_v20  ;;  %963 = vmatprep.subr.bf16.mxu1 %v270_v20  ;;  %v249_v7 = vpack.c.bf16 %v233_v5, %v232_v4 }
  0x6f   : > { %920 = vmatpush3.bf16.msra.mxu0 %v270_v20  ;;  %971 = vmatpush3.bf16.msra.mxu1 %v270_v20 }
  0x70   : > { %921 = vmatprep.subr.bf16.mxu0 %v271_v23  ;;  %964 = vmatprep.subr.bf16.mxu1 %v271_v23 }
  0x73   : > { %922 = vmatpush3.bf16.msra.mxu0 %v271_v23  ;;  %972 = vmatpush3.bf16.msra.mxu1 %v271_v23 }
  0x74   : > { %923 = vmatprep.subr.bf16.mxu0 %v272_v26  ;;  %965 = vmatprep.subr.bf16.mxu1 %v272_v26 }
  0x77   : > { %924 = vmatpush3.bf16.msra.mxu0 %v272_v26  ;;  %973 = vmatpush3.bf16.msra.mxu1 %v272_v26 }
  0x78   : > { %925 = vmatprep.subr.bf16.mxu0 %v273_v29  ;;  %966 = vmatprep.subr.bf16.mxu1 %v273_v29 }
  0x7b   : > { %926 = vmatpush3.bf16.msra.mxu0 %v273_v29  ;;  %974 = vmatpush3.bf16.msra.mxu1 %v273_v29 }
  0x7e   : > { %928 = vmatmul.mubr.bf16.vlgmr.msra.gmra.mrb[0].mxu0 %v235_v38  ;;  %944 = vmatmul.mubr.bf16.vlgmr.msra.gmra.mrb[0].mxu1 %v243_v39 }
  0x7f   : > { %931 = vmatprep.mubr.bf16.mxu0 %v236_v40  ;;  %947 = vmatprep.mubr.bf16.mxu1 %v244_v41 }
  0x86   : > { %932 = vmatmul.mubr.bf16.gmra.mrb[4].mxu0 %v237_v50  ;;  %948 = vmatmul.mubr.bf16.gmra.mrb[4].mxu1 %v245_v51 }
  0x87   : > { %935 = vmatprep.mubr.bf16.mxu0 %v238_v52  ;;  %951 = vmatprep.mubr.bf16.mxu1 %v246_v53 }
  0x8e   : > { %936 = vmatmul.mubr.bf16.gmra.mrb[8].mxu0 %v239_v62  ;;  %952 = vmatmul.mubr.bf16.gmra.mrb[8].mxu1 %v247_v63 }
  0x8f   : > { %939 = vmatprep.mubr.bf16.mxu0 %v240_v0  ;;  %955 = vmatprep.mubr.bf16.mxu1 %v248_v1 }
  0x96   : > { %940 = vmatmul.mubr.bf16.gmra.mrb[12].mxu0 %v241_v6  ;;  %956 = vmatmul.mubr.bf16.gmra.mrb[12].mxu1 %v249_v7 }
 0x151   : > { %v929_v8 = vpop.f32.mrb[0].mxu0  ;;  %v945_v9 = vpop.f32.mrb[0].mxu1 }
 0x152   : > { %v308_v10 = vpop.f32.mrb[1].mxu0  ;;  %v372_v11 = vpop.f32.mrb[1].mxu1 }
 0x153   : > { %v930_v12 = vpop.f32.mrb[2].mxu0  ;;  %v946_v13 = vpop.f32.mrb[2].mxu1 }
 0x154   : > { %v800_v14 = vpack.c.bf16 %v930_v12, %v929_v8  ;;  %v840_v15 = vpack.c.bf16 %v946_v13, %v945_v9  ;;  %v311_v16 = vpop.f32.mrb[3].mxu0  ;;  %v375_v17 = vpop.f32.mrb[3].mxu1 }
 0x155   : > { %v795_v18 = vpack.c.bf16 %v311_v16, %v308_v10  ;;  %v835_v19 = vpack.c.bf16 %v375_v17, %v372_v11 }
 0x156   : > { %872 = vst [vmem:[%s1411_s17 + $0x8] sm:$0xff] %v800_v14   ;;  %880 = vst [vmem:[%s1411_s17 + $0x48] sm:$0xff] %v840_v15  }
 0x157   : > { %796 = vst [vmem:[%s1411_s17] sm:$0xff] %v795_v18   ;;  %879 = vst [vmem:[%s1411_s17 + $0x40] sm:$0xff] %v835_v19  }
 0x159   : > { %v933_v20 = vpop.f32.mrb[4].mxu0  ;;  %v949_v21 = vpop.f32.mrb[4].mxu1 }
 0x15a   : > { %v324_v22 = vpop.f32.mrb[5].mxu0  ;;  %v388_v23 = vpop.f32.mrb[5].mxu1 }
 0x15b   : > { %v934_v24 = vpop.f32.mrb[6].mxu0  ;;  %v950_v25 = vpop.f32.mrb[6].mxu1 }
 0x15c   : > { %v810_v26 = vpack.c.bf16 %v934_v24, %v933_v20  ;;  %v850_v27 = vpack.c.bf16 %v950_v25, %v949_v21  ;;  %v327_v28 = vpop.f32.mrb[7].mxu0  ;;  %v391_v29 = vpop.f32.mrb[7].mxu1 }
 0x15d   : > { %v805_v30 = vpack.c.bf16 %v327_v28, %v324_v22  ;;  %v845_v31 = vpack.c.bf16 %v391_v29, %v388_v23 }
 0x15e   : > { %874 = vst [vmem:[%s1411_s17 + $0x18] sm:$0xff] %v810_v26   ;;  %882 = vst [vmem:[%s1411_s17 + $0x58] sm:$0xff] %v850_v27  }
 0x15f   : > { %873 = vst [vmem:[%s1411_s17 + $0x10] sm:$0xff] %v805_v30   ;;  %881 = vst [vmem:[%s1411_s17 + $0x50] sm:$0xff] %v845_v31  }
 0x161   : > { %v937_v32 = vpop.f32.mrb[8].mxu0  ;;  %v953_v33 = vpop.f32.mrb[8].mxu1 }
 0x162   : > { %v340_v34 = vpop.f32.mrb[9].mxu0  ;;  %v404_v35 = vpop.f32.mrb[9].mxu1 }
 0x163   : > { %v938_v36 = vpop.f32.mrb[10].mxu0  ;;  %v954_v37 = vpop.f32.mrb[10].mxu1 }
 0x164   : > { %v820_v38 = vpack.c.bf16 %v938_v36, %v937_v32  ;;  %v860_v39 = vpack.c.bf16 %v954_v37, %v953_v33  ;;  %v343_v40 = vpop.f32.mrb[11].mxu0  ;;  %v407_v41 = vpop.f32.mrb[11].mxu1 }
 0x165   : > { %v815_v42 = vpack.c.bf16 %v343_v40, %v340_v34  ;;  %v855_v43 = vpack.c.bf16 %v407_v41, %v404_v35 }
 0x166   : > { %876 = vst [vmem:[%s1411_s17 + $0x28] sm:$0xff] %v820_v38   ;;  %884 = vst [vmem:[%s1411_s17 + $0x68] sm:$0xff] %v860_v39  }
 0x167   : > { %875 = vst [vmem:[%s1411_s17 + $0x20] sm:$0xff] %v815_v42   ;;  %883 = vst [vmem:[%s1411_s17 + $0x60] sm:$0xff] %v855_v43  }
 0x169   : > { %v941_v44 = vpop.f32.mrb[12].mxu0  ;;  %v957_v45 = vpop.f32.mrb[12].mxu1 }
 0x16a   : > { %v356_v46 = vpop.f32.mrb[13].mxu0  ;;  %v420_v47 = vpop.f32.mrb[13].mxu1 }
 0x16b   : > { %v942_v48 = vpop.f32.mrb[14].mxu0  ;;  %v958_v49 = vpop.f32.mrb[14].mxu1 }
 0x16c   : > { %v830_v50 = vpack.c.bf16 %v942_v48, %v941_v44  ;;  %v870_v51 = vpack.c.bf16 %v958_v49, %v957_v45  ;;  %v359_v52 = vpop.f32.mrb[15].mxu0  ;;  %v423_v53 = vpop.f32.mrb[15].mxu1 }
 0x16d   : > { %v825_v54 = vpack.c.bf16 %v359_v52, %v356_v46  ;;  %v865_v55 = vpack.c.bf16 %v423_v53, %v420_v47 }
 0x16e   : > { %878 = vst [vmem:[%s1411_s17 + $0x38] sm:$0xff] %v830_v50   ;;  %886 = vst [vmem:[%s1411_s17 + $0x78] sm:$0xff] %v870_v51  }
 0x16f   : > { %877 = vst [vmem:[%s1411_s17 + $0x30] sm:$0xff] %v825_v54   ;;  %885 = vst [vmem:[%s1411_s17 + $0x70] sm:$0xff] %v865_v55  }
 0x170   : > { %1123 = shalt.err (!%p1120_p5)
}
 0x171   : > { %s1124_s23 = scalar_lea.hbm %s1430_s5, 2048  ;;  %s1128_s26 = scalar_lea.hbm %s1486_s2, 6144 }
 0x172   : > { %p1125_p9 = scmp.ne.s32.totalorder %s1430_s5, %s1124_s23  ;;  %p1129_p3 = scmp.lt.u32.totalorder %s1430_s5, %s1486_s2 }
 0x173   : > { %p1130_p7 = scmp.lt.u32.totalorder %s1128_s26, %s1124_s23  ;;  %p1132_p4 = scmp.lt.u32.totalorder %s1124_s23, %s1430_s5 }
 0x174   : > { %p1126_p1 = pnand %p1125_p9, %p1318_p11 }
 0x175   : > { %p1131_p13 = por %p1130_p7, %p1129_p3 }
 0x176   : > { %p1127_p2 = pneg %p1126_p1 }
 0x177   : > { %p1133_p6 = por %p1132_p4, %p1131_p13 }
 0x179   : > { %p1134_p8 = pnand %p1133_p6, %p1127_p2 }
 0x17b   : > { %1137 = shalt.err (!%p1134_p8)
}
 0x17c   : > { %s1203_s6 = smov 64   ;;  %s1204_s17 = smov 4  }
 0x17d   : > { %981 = dma.vmem_to_hbm [thread:$0]  (%p1318_p11), %s1432_s21, 2048, %s1430_s5, %s596_s12, %s1203_s6, %s1203_s6, %s1204_s17  }
 0x17e PF: > { %p998_p12 = scmp.ge.s32.totalorder %s1196_s14, 2  ;;  %s626_s19 = sand.u32 1, %s1176_s9  }
 0x17f   : > { %p1504_p10 = scmp.ne.s32.totalorder %s1494_s20, 0  ;;  %s627_s7 = scalar_lea.sflag [#allocation4], %s626_s19 }
 0x181   : > { %p992_p0 = pnand %p998_p12, %p1504_p10 }
 0x183   : > { %1171 = dma.done.wait (!%p992_p0), %s627_s7, 2048  }
 0x184   : > { %1173 = vsyncadd (!%p992_p0), %s627_s7, 4294965248  ;;  %s19_s14 = sadd.s32 1, %s1196_s14   ;;  %s1505_s9 = smov %s1180_s10 }
 0x185   : > { %p16_p5 = scmp.ge.s32.totalorder %s19_s14, 5   ;;  %s1506_s10 = smov %s1184_s11 }
 0x186   : > { %s1507_s11 = smov %s1327_s28  ;;  %s1508_s12 = smov %s1192_s13 }
 0x187   : > { %s1509_s13 = smov %s1511_s25  ;;  %18 = sbr.rel (!%p16_p5) target bundleno = 7 (0x7), region = 79 }
 0x18e   :  { %632 = vsyncpa [#allocation3], 1 }
 0x18f   :  { %634 = vsyncpa [#allocation3 + $0x1], 1 }
 0x190   :  { %635 = vsyncpa [#allocation6], 1 }
 0x191   :  { %637 = vsyncpa [#allocation6 + $0x1], 1 }
 0x192   :  { %638 = vsyncpa [#allocation4], 1 }
 0x193   :  { %640 = vsyncpa [#allocation4 + $0x1], 1 }

</bundles_post_ra>
